<compile_context>
chip_gen: v5e
topology: v5e:2x2
jax: 0.10.0
libtpu: 0.0.40
codegen_flags: <defaults>
</compile_context>

<pallas_src>
import jax
import jax.numpy as jnp
from jax.experimental import pallas as pl
from jax.experimental.pallas import tpu as pltpu

BN_EPS = 1e-5


def _round_up(x: int, m: int) -> int:
    return ((x + m - 1) // m) * m


# -----------------------------------------------------------------------------
# Kernel.
#   grid = (batch_tiles [parallel], k_steps [arbitrary])
#   refs: key_of_step [S] i32 (SMEM, scalar-prefetch),
#         x   [TB, TK]            bf16
#         W'  [TK, Hp]            bf16   (dense stack of folded per-key weights)
#         b1  [n_keys, 1, Hp]     f32    (folded Linear+BN bias, per key)
#         Wfc [n_keys, Hp, Op]    bf16   (per-key row-slice of the fc weight)
#         bfc [1, Op]             f32
#         out [TB, Op]            f32
#   scratch: acc [n_keys, TB, Hp] f32
# -----------------------------------------------------------------------------
def _moli_kernel(key_ref, x_ref, w_ref, b1_ref, wfc_ref, bfc_ref, out_ref,
                 acc_ref):
    s = pl.program_id(1)

    @pl.when(s == 0)
    def _():
        acc_ref[...] = jnp.zeros_like(acc_ref)

    # Accumulate this K step's partial product into its key's slot.
    k_idx = key_ref[s]
    acc_ref[k_idx] += jnp.dot(x_ref[...], w_ref[...],
                              preferred_element_type=jnp.float32)

    @pl.when(s == pl.num_programs(1) - 1)
    def _():
        # Folded bias + ReLU (f32, VPU); dropout is identity in eval mode.
        # Fused concat + final Linear: n_keys small MXU dots, summed.
        n_keys = acc_ref.shape[0]
        res = None
        for i in range(n_keys):  # static trace-time loop
            enc = jnp.maximum(acc_ref[i] + b1_ref[i], 0.0)
            c = jnp.dot(enc.astype(wfc_ref.dtype), wfc_ref[i],
                        preferred_element_type=jnp.float32)
            res = c if res is None else res + c
        out_ref[...] = res + bfc_ref[...]


# -----------------------------------------------------------------------------
# One-time weight packing (hoist out of the per-call path; cache the result).
# -----------------------------------------------------------------------------
def pack_moli_params(params: dict, bfc: jnp.ndarray, dim_out: int, *,
                     eps: float = BN_EPS, compute_dtype=jnp.bfloat16,
                     max_batch_tile: int = 256,
                     vmem_budget: int = 24 * 1024 * 1024):
    """params[key] = (W[Dk,H], b[1,H], gamma[1,H], beta[1,H], mean[1,H],
                      var[1,H], Wfc_k[H,O]).   bfc: [1, O]."""
    keys = list(params.keys())
    n_keys = len(keys)
    h_dim = params[keys[0]][0].shape[1]
    d_ins = [params[k][0].shape[0] for k in keys]

    h_pad = _round_up(h_dim, 128)
    o_pad = _round_up(dim_out, 128)

    # --- K tile: largest 128-multiple inside the VMEM budget ------------------
    fixed = (n_keys * max_batch_tile * h_pad * 4        # acc scratch (f32)
             + n_keys * h_pad * o_pad * 2               # resident Wfc (bf16)
             + n_keys * h_pad * 4 + o_pad * 4           # biases
             + 2 * max_batch_tile * o_pad * 4)          # double-buffered out
    per_tk = 4 * (max_batch_tile + h_pad)               # 2 bufs x (x + W') bf16
    tk_budget = max(0, vmem_budget - fixed) // per_tk
    tk = min(2048, max(128, (tk_budget // 128) * 128),
             _round_up(max(d_ins), 128))

    segs = [_round_up(d, tk) for d in d_ins]             # per-key padded widths
    steps = [seg // tk for seg in segs]
    k_packed = sum(segs)

    # --- fold BN + bias, stack weights densely (no zero blocks) --------------
    w_stacked = jnp.zeros((k_packed, h_pad), jnp.float32)
    b1 = jnp.zeros((n_keys, 1, h_pad), jnp.float32)
    wfc = jnp.zeros((n_keys, h_pad, o_pad), jnp.float32)
    key_of_step = []
    row = 0
    for i, name in enumerate(keys):
        w, b, gamma, beta, mean, var, wfc_k = params[name]
        scale = gamma * jax.lax.rsqrt(var + eps)                     # [1, H]
        w_stacked = w_stacked.at[row:row + d_ins[i], :h_dim].set(w * scale)
        b1 = b1.at[i, :, :h_dim].set((b - mean) * scale + beta)
        wfc = wfc.at[i, :h_dim, :dim_out].set(wfc_k)
        key_of_step += [i] * steps[i]
        row += segs[i]

    bfc_pad = jnp.zeros((1, o_pad), jnp.float32).at[:, :dim_out].set(bfc)

    return dict(
        keys=tuple(keys), d_ins=tuple(d_ins), segs=tuple(segs),
        tk=tk, h_pad=h_pad, o_pad=o_pad, dim_out=dim_out,
        key_of_step=jnp.asarray(key_of_step, jnp.int32),
        w=w_stacked.astype(compute_dtype),
        b1=b1,
        wfc=wfc.astype(compute_dtype),
        bfc=bfc_pad,
        compute_dtype=compute_dtype,
    )


# -----------------------------------------------------------------------------
# Forward (per-call path: activation packing + pallas_call only).
# -----------------------------------------------------------------------------
def moli_forward(packed: dict, inputs: dict):
    keys = packed["keys"]
    tk = packed["tk"]
    h_pad = packed["h_pad"]
    o_pad = packed["o_pad"]
    n_keys = len(keys)
    dtype = packed["compute_dtype"]
    batch = inputs[keys[0]].shape[0]

    # Batch tiling: full batch (16-rounded for bf16 sublane packing) up to 256,
    # else 256-row tiles (matches v6e/v7x MXU rows; fewer weight re-streams).
    if batch <= 256:
        tb = _round_up(batch, 16)
        b_pad = tb
    else:
        tb = 256
        b_pad = _round_up(batch, tb)

    # Pack activations: cast to bf16 FIRST, pad each view to its tk-aligned
    # segment, concat along features (layout matches the stacked weight rows).
    x_parts = []
    for name, d, seg in zip(keys, packed["d_ins"], packed["segs"]):
        xk = inputs[name].astype(dtype)
        x_parts.append(jnp.pad(xk, ((0, b_pad - batch), (0, seg - d))))
    x = jnp.concatenate(x_parts, axis=1)                  # [b_pad, sum segs]

    total_steps = int(packed["key_of_step"].shape[0])
    grid = (b_pad // tb, total_steps)

    out = pl.pallas_call(
        _moli_kernel,
        out_shape=jax.ShapeDtypeStruct((b_pad, o_pad), jnp.float32),
        grid_spec=pltpu.PrefetchScalarGridSpec(
            num_scalar_prefetch=1,
            grid=grid,
            in_specs=[
                pl.BlockSpec((tb, tk), lambda b, s, ks: (b, s)),           # x
                pl.BlockSpec((tk, h_pad), lambda b, s, ks: (s, 0)),        # W'
                pl.BlockSpec((n_keys, 1, h_pad),
                             lambda b, s, ks: (0, 0, 0)),                  # b1
                pl.BlockSpec((n_keys, h_pad, o_pad),
                             lambda b, s, ks: (0, 0, 0)),                  # Wfc
                pl.BlockSpec((1, o_pad), lambda b, s, ks: (0, 0)),         # bfc
            ],
            out_specs=pl.BlockSpec((tb, o_pad), lambda b, s, ks: (b, 0)),
            scratch_shapes=[pltpu.VMEM((n_keys, tb, h_pad), jnp.float32)],
        ),
        compiler_params=pltpu.CompilerParams(
            dimension_semantics=("parallel", "arbitrary"),
            vmem_limit_bytes=32 * 1024 * 1024,
        ),
    )(packed["key_of_step"], x, packed["w"], packed["b1"],
      packed["wfc"], packed["bfc"])

    return out[:batch, :packed["dim_out"]]


# -----------------------------------------------------------------------------
# References for correctness checking.
# -----------------------------------------------------------------------------
def moli_reference(inputs, params, bfc):
    """Plain-JAX f32 reference with the original (unfolded) math."""
    acc = None
    for key in inputs:
        w, b, g, be, mu, var, wfc = params[key]
        h = inputs[key] @ w + b
        h = (h - mu) * g / jnp.sqrt(var + BN_EPS) + be
        h = jnp.maximum(h, 0.0)
        contrib = h @ wfc
        acc = contrib if acc is None else acc + contrib
    return acc + bfc


def moli_reference_bf16(inputs, params, bfc):
    """Emulates the kernel's math: BN folded, bf16-rounded matmul operands,
    f32 accumulation."""
    def q(a):
        return a.astype(jnp.bfloat16).astype(jnp.float32)

    acc = None
    for key in inputs:
        w, b, g, be, mu, var, wfc = params[key]
        scale = g * jax.lax.rsqrt(var + BN_EPS)
        h = jnp.dot(q(inputs[key]), q(w * scale),
                    precision=jax.lax.Precision.HIGHEST)
        h = h + (b - mu) * scale + be
        h = jnp.maximum(h, 0.0)
        contrib = jnp.dot(q(h), q(wfc), precision=jax.lax.Precision.HIGHEST)
        acc = contrib if acc is None else acc + contrib
    return acc + bfc


if __name__ == "__main__":
    # Small, MOLI-like configuration: three omics views of different widths.
    df_dict = {"expression": 40, "mutation": 16, "cnv": 24}
    h_dim = 32
    dim_out = 8
    batch = 8

    key = jax.random.PRNGKey(0)

    inputs = {}
    params = {}
    for name, d_in in df_dict.items():
        key, kx, kw, kb, kg, kbe, kmu, kvar, kwfc = jax.random.split(key, 9)
        inputs[name] = jax.random.normal(kx, (batch, d_in), jnp.float32)
        w = jax.random.normal(kw, (d_in, h_dim), jnp.float32) * (1.0 / jnp.sqrt(d_in))
        b = jax.random.normal(kb, (1, h_dim), jnp.float32) * 0.1
        gamma = 1.0 + 0.1 * jax.random.normal(kg, (1, h_dim), jnp.float32)
        beta = 0.1 * jax.random.normal(kbe, (1, h_dim), jnp.float32)
        run_mean = 0.1 * jax.random.normal(kmu, (1, h_dim), jnp.float32)
        run_var = jnp.abs(jax.random.normal(kvar, (1, h_dim), jnp.float32)) + 0.5
        # Per-key row slice of the fc weight (fc acts on the concat of encodings).
        wfc_k = jax.random.normal(kwfc, (h_dim, dim_out), jnp.float32) * (
            1.0 / jnp.sqrt(h_dim * len(df_dict)))
        params[name] = (w, b, gamma, beta, run_mean, run_var, wfc_k)

    key, kbfc = jax.random.split(key)
    bfc = jax.random.normal(kbfc, (1, dim_out), jnp.float32) * 0.1

    # Pack weights once (BN folding, stacking, bf16 casts) — outside the
    # per-call path.
    packed = pack_moli_params(params, bfc, dim_out)

    out = moli_forward(packed, inputs)
    out = jax.block_until_ready(out)
    assert out.shape == (batch, dim_out)

    # Tight check against a reference with identical (bf16-operand) math.
    ref_q = moli_reference_bf16(inputs, params, bfc)
    assert jnp.allclose(out, ref_q, atol=2e-3, rtol=2e-3), (
        f"max abs err vs bf16 reference {jnp.max(jnp.abs(out - ref_q))}")

    # Loose sanity check against the full-precision f32 reference.
    ref_f32 = moli_reference(inputs, params, bfc)
    assert jnp.allclose(out, ref_f32, atol=1e-1, rtol=1e-1), (
        f"max abs err vs f32 reference {jnp.max(jnp.abs(out - ref_f32))}")

    print("KERNEL_OK")
</pallas_src>

<mosaic_0001>
module attributes {stable_mosaic.version = 11 : i64} {
  func.func @_moli_kernel(%arg0: i32, %arg1: i32, %arg2: memref<3xi32, #tpu.memory_space<smem>>, %arg3: memref<16x128xbf16, #tpu.memory_space<vmem>>, %arg4: memref<128x128xbf16, #tpu.memory_space<vmem>>, %arg5: memref<3x1x128xf32, #tpu.memory_space<vmem>>, %arg6: memref<3x128x128xbf16, #tpu.memory_space<vmem>>, %arg7: memref<1x128xf32, #tpu.memory_space<vmem>>, %arg8: memref<16x128xf32, #tpu.memory_space<vmem>>, %arg9: memref<3x16x128xf32, #tpu.memory_space<vmem>>) attributes {dimension_semantics = [#tpu.dimension_semantics<parallel>, #tpu.dimension_semantics<arbitrary>], iteration_bounds = array<i64: 1, 3>, scalar_prefetch = 1 : i64, scratch_operands = 1 : i64, tpu.core_type = #tpu.core_type<tc>, window_params = [{transform_indices = @transform_0, window_bounds = array<i64: 16, 128>}, {transform_indices = @transform_1, window_bounds = array<i64: 128, 128>}, {pipeline_mode = #tpu.pipeline_mode<synchronous>, transform_indices = @transform_2, window_bounds = array<i64: 3, 1, 128>}, {pipeline_mode = #tpu.pipeline_mode<synchronous>, transform_indices = @transform_3, window_bounds = array<i64: 3, 128, 128>}, {pipeline_mode = #tpu.pipeline_mode<synchronous>, transform_indices = @transform_4, window_bounds = array<i64: 1, 128>}, {transform_indices = @transform_5, window_bounds = array<i64: 16, 128>}]} {
    %c0_i32 = arith.constant 0 : i32
    %0 = arith.cmpi eq, %arg1, %c0_i32 : i32
    %1 = arith.extui %0 : i1 to i32
    %c0_i32_0 = arith.constant 0 : i32
    %2 = arith.cmpi ne, %1, %c0_i32_0 : i32
    scf.if %2 {
      %cst_9 = arith.constant 0.000000e+00 : f32
      %19 = vector.broadcast %cst_9 : f32 to vector<3x16x128xf32>
      %c0_10 = arith.constant 0 : index
      %c0_11 = arith.constant 0 : index
      %c0_12 = arith.constant 0 : index
      %20 = vector.load %arg9[%c0_10, %c0_11, %c0_12] : memref<3x16x128xf32, #tpu.memory_space<vmem>>, vector<3x16x128xf32>
      tpu.vector_store %arg9[%c0_10, %c0_11, %c0_12], %19 {strides = array<i32>} : memref<3x16x128xf32, #tpu.memory_space<vmem>>, vector<3x16x128xf32>,
    } else {
    }
    %3 = arith.index_cast %arg1 : i32 to index
    %4 = memref.load %arg2[%3] : memref<3xi32, #tpu.memory_space<smem>>
    %5 = arith.index_cast %4 : i32 to index
    %c0 = arith.constant 0 : index
    %c0_1 = arith.constant 0 : index
    %6 = vector.load %arg9[%5, %c0, %c0_1] : memref<3x16x128xf32, #tpu.memory_space<vmem>>, vector<1x16x128xf32>
    %7 = vector.shape_cast %6 : vector<1x16x128xf32> to vector<16x128xf32>
    %c0_2 = arith.constant 0 : index
    %c0_3 = arith.constant 0 : index
    %8 = vector.load %arg3[%c0_2, %c0_3] : memref<16x128xbf16, #tpu.memory_space<vmem>>, vector<16x128xbf16>
    %c0_4 = arith.constant 0 : index
    %c0_5 = arith.constant 0 : index
    %9 = vector.load %arg4[%c0_4, %c0_5] : memref<128x128xbf16, #tpu.memory_space<vmem>>, vector<128x128xbf16>
    %cst = arith.constant dense<0.000000e+00> : vector<16x128xf32>
    %10 = tpu.matmul %8, %9, %cst {dimension_numbers = #tpu.dot_dimension_numbers<[1], [0], [0], [1], [0, 0, 1, 1], [], []>} : vector<16x128xbf16>, vector<128x128xbf16>, vector<16x128xf32> -> vector<16x128xf32>
    %11 = arith.addf %7, %10 : vector<16x128xf32>
    %12 = arith.index_cast %4 : i32 to index
    %c0_6 = arith.constant 0 : index
    %c0_7 = arith.constant 0 : index
    %13 = vector.load %arg9[%12, %c0_6, %c0_7] : memref<3x16x128xf32, #tpu.memory_space<vmem>>, vector<1x16x128xf32>
    %14 = vector.shape_cast %13 : vector<1x16x128xf32> to vector<16x128xf32>
    %15 = vector.shape_cast %11 : vector<16x128xf32> to vector<1x16x128xf32>
    tpu.vector_store %arg9[%12, %c0_6, %c0_7], %15 {strides = array<i32>} : memref<3x16x128xf32, #tpu.memory_space<vmem>>, vector<1x16x128xf32>,
    %c2_i32 = arith.constant 2 : i32
    %16 = arith.cmpi eq, %arg1, %c2_i32 : i32
    %17 = arith.extui %16 : i1 to i32
    %c0_i32_8 = arith.constant 0 : i32
    %18 = arith.cmpi ne, %17, %c0_i32_8 : i32
    scf.if %18 {
      %c0_9 = arith.constant 0 : index
      %c0_10 = arith.constant 0 : index
      %c0_11 = arith.constant 0 : index
      %19 = vector.load %arg9[%c0_9, %c0_10, %c0_11] : memref<3x16x128xf32, #tpu.memory_space<vmem>>, vector<1x16x128xf32>
      %20 = vector.shape_cast %19 : vector<1x16x128xf32> to vector<16x128xf32>
      %c0_12 = arith.constant 0 : index
      %c0_13 = arith.constant 0 : index
      %c0_14 = arith.constant 0 : index
      %21 = vector.load %arg5[%c0_12, %c0_13, %c0_14] : memref<3x1x128xf32, #tpu.memory_space<vmem>>, vector<1x1x128xf32>
      %22 = vector.shape_cast %21 : vector<1x1x128xf32> to vector<1x128xf32>
      %23 = vector.broadcast %22 : vector<1x128xf32> to vector<16x128xf32>
      %24 = arith.addf %20, %23 : vector<16x128xf32>
      %cst_15 = arith.constant 0.000000e+00 : f32
      %25 = vector.broadcast %cst_15 : f32 to vector<16x128xf32>
      %26 = arith.maximumf %24, %25 : vector<16x128xf32>
      %27 = arith.truncf %26 : vector<16x128xf32> to vector<16x128xbf16>
      %c0_16 = arith.constant 0 : index
      %c0_17 = arith.constant 0 : index
      %c0_18 = arith.constant 0 : index
      %28 = vector.load %arg6[%c0_16, %c0_17, %c0_18] : memref<3x128x128xbf16, #tpu.memory_space<vmem>>, vector<1x128x128xbf16>
      %29 = vector.shape_cast %28 : vector<1x128x128xbf16> to vector<128x128xbf16>
      %cst_19 = arith.constant dense<0.000000e+00> : vector<16x128xf32>
      %30 = tpu.matmul %27, %29, %cst_19 {dimension_numbers = #tpu.dot_dimension_numbers<[1], [0], [0], [1], [0, 0, 1, 1], [], []>} : vector<16x128xbf16>, vector<128x128xbf16>, vector<16x128xf32> -> vector<16x128xf32>
      %c1 = arith.constant 1 : index
      %c0_20 = arith.constant 0 : index
      %c0_21 = arith.constant 0 : index
      %31 = vector.load %arg9[%c1, %c0_20, %c0_21] : memref<3x16x128xf32, #tpu.memory_space<vmem>>, vector<1x16x128xf32>
      %32 = vector.shape_cast %31 : vector<1x16x128xf32> to vector<16x128xf32>
      %c1_22 = arith.constant 1 : index
      %c0_23 = arith.constant 0 : index
      %c0_24 = arith.constant 0 : index
      %33 = vector.load %arg5[%c1_22, %c0_23, %c0_24] : memref<3x1x128xf32, #tpu.memory_space<vmem>>, vector<1x1x128xf32>
      %34 = vector.shape_cast %33 : vector<1x1x128xf32> to vector<1x128xf32>
      %35 = vector.broadcast %34 : vector<1x128xf32> to vector<16x128xf32>
      %36 = arith.addf %32, %35 : vector<16x128xf32>
      %cst_25 = arith.constant 0.000000e+00 : f32
      %37 = vector.broadcast %cst_25 : f32 to vector<16x128xf32>
      %38 = arith.maximumf %36, %37 : vector<16x128xf32>
      %39 = arith.truncf %38 : vector<16x128xf32> to vector<16x128xbf16>
      %c1_26 = arith.constant 1 : index
      %c0_27 = arith.constant 0 : index
      %c0_28 = arith.constant 0 : index
      %40 = vector.load %arg6[%c1_26, %c0_27, %c0_28] : memref<3x128x128xbf16, #tpu.memory_space<vmem>>, vector<1x128x128xbf16>
      %41 = vector.shape_cast %40 : vector<1x128x128xbf16> to vector<128x128xbf16>
      %cst_29 = arith.constant dense<0.000000e+00> : vector<16x128xf32>
      %42 = tpu.matmul %39, %41, %cst_29 {dimension_numbers = #tpu.dot_dimension_numbers<[1], [0], [0], [1], [0, 0, 1, 1], [], []>} : vector<16x128xbf16>, vector<128x128xbf16>, vector<16x128xf32> -> vector<16x128xf32>
      %43 = arith.addf %30, %42 : vector<16x128xf32>
      %c2 = arith.constant 2 : index
      %c0_30 = arith.constant 0 : index
      %c0_31 = arith.constant 0 : index
      %44 = vector.load %arg9[%c2, %c0_30, %c0_31] : memref<3x16x128xf32, #tpu.memory_space<vmem>>, vector<1x16x128xf32>
      %45 = vector.shape_cast %44 : vector<1x16x128xf32> to vector<16x128xf32>
      %c2_32 = arith.constant 2 : index
      %c0_33 = arith.constant 0 : index
      %c0_34 = arith.constant 0 : index
      %46 = vector.load %arg5[%c2_32, %c0_33, %c0_34] : memref<3x1x128xf32, #tpu.memory_space<vmem>>, vector<1x1x128xf32>
      %47 = vector.shape_cast %46 : vector<1x1x128xf32> to vector<1x128xf32>
      %48 = vector.broadcast %47 : vector<1x128xf32> to vector<16x128xf32>
      %49 = arith.addf %45, %48 : vector<16x128xf32>
      %cst_35 = arith.constant 0.000000e+00 : f32
      %50 = vector.broadcast %cst_35 : f32 to vector<16x128xf32>
      %51 = arith.maximumf %49, %50 : vector<16x128xf32>
      %52 = arith.truncf %51 : vector<16x128xf32> to vector<16x128xbf16>
      %c2_36 = arith.constant 2 : index
      %c0_37 = arith.constant 0 : index
      %c0_38 = arith.constant 0 : index
      %53 = vector.load %arg6[%c2_36, %c0_37, %c0_38] : memref<3x128x128xbf16, #tpu.memory_space<vmem>>, vector<1x128x128xbf16>
      %54 = vector.shape_cast %53 : vector<1x128x128xbf16> to vector<128x128xbf16>
      %cst_39 = arith.constant dense<0.000000e+00> : vector<16x128xf32>
      %55 = tpu.matmul %52, %54, %cst_39 {dimension_numbers = #tpu.dot_dimension_numbers<[1], [0], [0], [1], [0, 0, 1, 1], [], []>} : vector<16x128xbf16>, vector<128x128xbf16>, vector<16x128xf32> -> vector<16x128xf32>
      %56 = arith.addf %43, %55 : vector<16x128xf32>
      %c0_40 = arith.constant 0 : index
      %c0_41 = arith.constant 0 : index
      %57 = vector.load %arg7[%c0_40, %c0_41] : memref<1x128xf32, #tpu.memory_space<vmem>>, vector<1x128xf32>
      %58 = vector.broadcast %57 : vector<1x128xf32> to vector<16x128xf32>
      %59 = arith.addf %56, %58 : vector<16x128xf32>
      %c0_42 = arith.constant 0 : index
      %c0_43 = arith.constant 0 : index
      %60 = vector.load %arg8[%c0_42, %c0_43] : memref<16x128xf32, #tpu.memory_space<vmem>>, vector<16x128xf32>
      tpu.vector_store %arg8[%c0_42, %c0_43], %59 {strides = array<i32>} : memref<16x128xf32, #tpu.memory_space<vmem>>, vector<16x128xf32>,
    } else {
    }
    return
  }
  func.func @transform_0(%arg0: i32, %arg1: i32, %arg2: memref<3xi32, #tpu.memory_space<smem>>) -> (i32, i32) {
    %c0_i32 = arith.constant 0 : i32
    return %arg0, %arg1 : i32, i32
  }
  func.func @transform_1(%arg0: i32, %arg1: i32, %arg2: memref<3xi32, #tpu.memory_space<smem>>) -> (i32, i32) {
    %c0_i32 = arith.constant 0 : i32
    %c0_i32_0 = arith.constant 0 : i32
    return %arg1, %c0_i32 : i32, i32
  }
  func.func @transform_2(%arg0: i32, %arg1: i32, %arg2: memref<3xi32, #tpu.memory_space<smem>>) -> (i32, i32, i32) {
    %c0_i32 = arith.constant 0 : i32
    %c0_i32_0 = arith.constant 0 : i32
    %c0_i32_1 = arith.constant 0 : i32
    %c0_i32_2 = arith.constant 0 : i32
    return %c0_i32, %c0_i32_0, %c0_i32_1 : i32, i32, i32
  }
  func.func @transform_3(%arg0: i32, %arg1: i32, %arg2: memref<3xi32, #tpu.memory_space<smem>>) -> (i32, i32, i32) {
    %c0_i32 = arith.constant 0 : i32
    %c0_i32_0 = arith.constant 0 : i32
    %c0_i32_1 = arith.constant 0 : i32
    %c0_i32_2 = arith.constant 0 : i32
    return %c0_i32, %c0_i32_0, %c0_i32_1 : i32, i32, i32
  }
  func.func @transform_4(%arg0: i32, %arg1: i32, %arg2: memref<3xi32, #tpu.memory_space<smem>>) -> (i32, i32) {
    %c0_i32 = arith.constant 0 : i32
    %c0_i32_0 = arith.constant 0 : i32
    %c0_i32_1 = arith.constant 0 : i32
    return %c0_i32, %c0_i32_0 : i32, i32
  }
  func.func @transform_5(%arg0: i32, %arg1: i32, %arg2: memref<3xi32, #tpu.memory_space<smem>>) -> (i32, i32) {
    %c0_i32 = arith.constant 0 : i32
    %c0_i32_0 = arith.constant 0 : i32
    return %arg0, %c0_i32 : i32, i32
  }
}

</mosaic_0001>

<bundles_post_ra>
// kernel: tpu_custom_call.1
= control target key start
LH: loop header
LB: loop body
LE: loop exit
PB: predicated region body
PF: predicated region fallthrough
CT: control target
= control target key end

     0   :  { %s1373_s24 = smov [#allocation4]   ;;  %s1586_s0 = inlined_call_operand.hbm [shape: s32[3], index: 0, kind: input, shape index: {}]   ;;  %s1587_s1 = inlined_call_operand.hbm [shape: bf16[16,384], index: 1, kind: input, shape index: {}]   ;;  %s1588_s2 = inlined_call_operand.hbm [shape: bf16[384,128], index: 2, kind: input, shape index: {}]   ;;  %s1589_s3 = inlined_call_operand.hbm [shape: f32[3,1,128], index: 3, kind: input, shape index: {}]   ;;  %s1590_s4 = inlined_call_operand.hbm [shape: bf16[3,128,128], index: 4, kind: input, shape index: {}]   ;;  %s1591_s5 = inlined_call_operand.vmem [shape: f32[1,128], index: 5, kind: input, shape index: {}]   ;;  %s1592_s6 = inlined_call_operand.hbm [shape: f32[16,128], index: 6, kind: output, shape index: {}]  }
   0x1   :  { %1595 = sst [smem:[#allocation20_spill]] %s1587_s1  ;;  %s12_s23 = sshll.u32 %s1586_s0, 4  ;;  %s13_s23 = int_to_ptr.hbm [resolvable:$true] %s12_s23 }
   0x2   :  { %1596 = sst [smem:[#allocation21_spill]] %s1589_s3 }
   0x3   :  { %1597 = sst [smem:[#allocation22_spill]] %s1590_s4 }
   0x4   :  { %15 = dma.hbm_to_smem %s13_s23, 16, %s1373_s24, [#allocation3] }
   0x5   :  { %1327 = dma.done.wait [#allocation3], 16 }
   0x6   :  { %1328 = vsyncadd [#allocation3], 4294967280 }
   0x7   :  { %18 = sfence }
   0x8   :  { %19 = vsyncpa [#allocation6], 0 }
   0x9   :  { %21 = vsyncpa [#allocation6 + $0x1], 0 }
   0xa   :  { %22 = vsyncpa [#allocation9], 0 }
   0xb   :  { %24 = vsyncpa [#allocation9 + $0x1], 0 }
   0xc   :  { %25 = vsyncpa [#allocation12], 0 }
   0xd   :  { %26 = vsyncpa [#allocation7], 0  ;;  %s1423_s25 = smov 0   ;;  %s1425_s26 = smov 0  }
   0xe   :  { %s1427_s27 = smov 0   ;;  %s1429_s28 = smov 0  }
   0xf   :  { %s1431_s0 = smov 0   ;;  %s1433_s29 = smov 0  }
  0x10 LB: > { %s1452_s30 = sadd.s32 4294967295, %s1371_s29   ;;  %p66_p0 = scmp.ne.s32.totalorder %s1355_s26, %s1351_s25  ;;  %s1371_s29 = sphi %s1433_s29, %s32_s29   ;;  %s1367_s0 = sphi %s1431_s0, %s1610_s0   ;;  %s1363_s28 = sphi %s1429_s28, %s1609_s28   ;;  %s1359_s27 = sphi %s1427_s27, %s1608_s27   ;;  %s1355_s26 = sphi %s1425_s26, %s1607_s26   ;;  %s1351_s25 = sphi %s1423_s25, %s1606_s25  }
  0x11   : > { %p67_p1 = scmp.eq.s32.totalorder %s1452_s30, 0  ;;  %p855_p2 = scmp.ge.s32.totalorder %s1371_s29, 1 }
  0x12   : > { %p192_p3 = scmp.lt.s32.totalorder %s1371_s29, 4  ;;  %s1599_s3 = sld [smem:[#allocation21_spill]] }
  0x13   : > { %p1460_p4 = por %p67_p1, %p66_p0  ;;  %s1374_s12 = smov [#allocation10]  }
  0x14   : > { %p1467_p5 = pnand %p855_p2, %p192_p3  ;;  %s205_s13 = sshll.u32 %s1374_s12, 4  ;;  %s206_s13 = int_to_ptr.vmem [resolvable:$true] %s205_s13 }
  0x15   : > { %s1601_s4 = sld [smem:[#allocation22_spill]]  ;;  %s1375_s17 = smov 16  }
  0x16   : > { %p1058_p6 = pneg %p1467_p5  ;;  %s1376_s18 = smov 1  }
  0x17   : > { %s1377_s19 = smov [#allocation11]   ;;  %s1593_s21 = smov 64  }
  0x18   : > { %s203_s10 = sshll.u32 %s1599_s3, 4  ;;  %p1059_p7 = pnand %p1058_p6, %p67_p1  ;;  %s204_s10 = int_to_ptr.hbm [resolvable:$true] %s203_s10 }
  0x19   : > { %s219_s20 = sshll.u32 %s1377_s19, 4  ;;  %s1379_s22 = smov 4   ;;  %s220_s20 = int_to_ptr.vmem [resolvable:$true] %s219_s20 }
  0x1a   : > { %1061 = dma.hbm_to_vmem [thread:$0]  (!%p1059_p7), %s204_s10, 48, %s206_s13, [#allocation9], %s1375_s17, %s1375_s17, %s1376_s18  }
  0x1b   : > { %s217_s16 = sshll.u32 %s1601_s4, 4  ;;  %s41_s23 = sadd.s32 1, %s1367_s0  ;;  %s218_s16 = int_to_ptr.hbm [resolvable:$true] %s217_s16 }
  0x1c   : > { %1064 = dma.hbm_to_vmem [thread:$0]  (!%p1059_p7), %s218_s16, 3072, %s220_s20, [#allocation12], %s1593_s21, %s1593_s21, %s1379_s22  }
  0x1d   : > { %s53_s24 = sadd.s32 1, %s1359_s27  ;;  %p42_p8 = scmp.ge.s32.totalorder %s41_s23, 3 }
  0x1e   : > { %p60_p9 = scmp.ne.s32.totalorder %s1359_s27, %s1355_s26  ;;  %p61_p10 = scmp.eq.s32.totalorder %s1371_s29, 0 }
  0x1f   : > { %p1074_p11 = scmp.lt.s32.totalorder %s1371_s29, 3  ;;  %s1612_s23 = smov (%p42_p8, %s41_s23), 0 }
  0x20   : > { %p1489_p12 = por %p61_p10, %p60_p9  ;;  %s236_s8 = sand.u32 1, %s1359_s27  }
  0x21   : > { %s49_s9 = ssub.s32 %s1367_s0, %s1612_s23  ;;  %s859_s10 = sshll.u32 %s236_s8, 3 }
  0x22   : > { %p51_p13 = scmp.eq.s32.totalorder %s49_s9, 0  ;;  %s860_s12 = sshll.u32 %s1367_s0, 2 }
  0x23   : > { %s1603_s1 = sld [smem:[#allocation20_spill]]  ;;  %s240_s17 = scalar_lea.vmem [#allocation5], %s859_s10 }
  0x24   : > { %s1498_s13 = scalar_select %p51_p13, %s1359_s27, %s53_s24  }
  0x25   : > { %s250_s18 = sshll.u32 %s240_s17, 4  ;;  %p1507_p0 = pnand %p1074_p11, %p1489_p12  ;;  %s251_s18 = int_to_ptr.vmem [resolvable:$true] %s250_s18 }
  0x26   : > { %s260_s9 = sand.u32 1, %s1371_s29   ;;  %s237_s24 = scalar_lea.sflag [#allocation6], %s236_s8 }
  0x27   : > { %s1380_s21 = smov 192   ;;  %s1605_s14 = smov 64  }
  0x28   : > { %s861_s10 = sshll.u32 %s236_s8, 6  ;;  %s261_s4 = scalar_lea.sflag [#allocation9], %s260_s9 }
  0x29   : > { %s247_s16 = scalar_lea.hbm %s1603_s1, %s860_s12  ;;  %s1008_s12 = sshll.u32 %s1367_s0, 6 }
  0x2a   : > { %s248_s19 = sshll.u32 %s247_s16, 4  ;;  %s269_s25 = scalar_lea.hbm %s1588_s2, %s1008_s12  ;;  %s249_s19 = int_to_ptr.hbm [resolvable:$true] %s248_s19 }
  0x2b   : > { %1068 = dma.hbm_to_vmem [thread:$0]  (!%p1507_p0), %s249_s19, 128, %s251_s18, %s237_s24, %s1380_s21, %s1605_s14, %s1379_s22  }
  0x2c   : > { %s270_s17 = sshll.u32 %s269_s25, 4  ;;  %s264_s1 = scalar_lea.vmem [#allocation8], %s861_s10  ;;  %s271_s17 = int_to_ptr.hbm [resolvable:$true] %s270_s17 }
  0x2d   : > { %s272_s3 = sshll.u32 %s264_s1, 4  ;;  %284 = sbr.rel (%p1467_p5) target bundleno = 426 (0x1aa), region = 40  ;;  %s273_s3 = int_to_ptr.vmem [resolvable:$true] %s272_s3 }
  0x2e   : > { %1071 = dma.hbm_to_vmem [thread:$0]  (!%p1507_p0), %s271_s17, 1024, %s273_s3, %s261_s4, %s1605_s14, %s1605_s14, %s1379_s22  }
  0x2f   : > { %s286_s21 = sand.u32 (!%p1467_p5), 1, %s1355_s26  }
  0x30   : > { %s865_s8 = sshll.u32 (!%p1467_p5), %s286_s21, 3  ;;  %s287_s18 = scalar_lea.sflag (!%p1467_p5), [#allocation6], %s286_s21 }
  0x31   : > { %s1528_s19 = scalar_lea.vmem (!%p1467_p5), [#allocation5], %s865_s8 }
  0x32   : > { %1330 = dma.done.wait (%p1460_p4), %s287_s18, 128  }
  0x33   : > { %1332 = vsyncadd (%p1460_p4), %s287_s18, 4294967168  ;;  %s296_s1 = sand.u32 1, %s1452_s30   ;;  %s866_s20 = sshll.u32 %s286_s21, 6 }
  0x34   : > { %s297_s3 = scalar_lea.sflag [#allocation9], %s296_s1  ;;  %s1535_s4 = scalar_lea.vmem [#allocation8], %s866_s20 }
  0x35   : > { %1334 = dma.done.wait (%p1460_p4), %s297_s3, 1024  }
  0x36   : > { %1336 = vsyncadd (%p1460_p4), %s297_s3, 4294966272 }
  0x37   : > { %1338 = dma.done.wait (%p67_p1), [#allocation9], 48  }
  0x38   : > { %1340 = vsyncadd (%p67_p1), [#allocation9], 4294967248 }
  0x39   : > { %1342 = dma.done.wait (%p67_p1), [#allocation12], 3072  }
  0x3a   : > { %1344 = vsyncadd (%p67_p1), [#allocation12], 4294964224  ;;  %p869_p2 = scmp.ne.s32.totalorder %s1363_s28, 0 }
  0x3c   : > { %344 = sbr.rel (%p869_p2) target bundleno = 72 (0x48), region = 60 }
  0x41   : > { %v1381_v0 = vmov 0.0  }
  0x42   : > { %345 = vst [vmem:[#allocation2] sm:$0xff] %v1381_v0 }
  0x43   : > { %346 = vst [vmem:[#allocation2 + $0x8] sm:$0xff] %v1381_v0 }
  0x44   : > { %347 = vst [vmem:[#allocation2 + $0x10] sm:$0xff] %v1381_v0 }
  0x45   : > { %348 = vst [vmem:[#allocation2 + $0x18] sm:$0xff] %v1381_v0 }
  0x46   : > { %349 = vst [vmem:[#allocation2 + $0x20] sm:$0xff] %v1381_v0 }
  0x47   : > { %350 = vst [vmem:[#allocation2 + $0x28] sm:$0xff] %v1381_v0 }
  0x48 PF: > { %v1017_v1 = vld [vmem:[%s1535_s4 + $0x38] sm:$0xff]  ;;  %v1016_v2 = vld [vmem:[%s1535_s4 + $0x30] sm:$0xff]  ;;  %v1015_v3 = vld [vmem:[%s1535_s4 + $0x28] sm:$0xff]  ;;  %s351_s7 = sld [smem:[#allocation4 + %s1363_s28]]  ;;  %p907_p1 = scmp.ne.s32.totalorder %s1363_s28, 2 }
  0x49   : > { %428 = vmatpush.bf16.msra.mxu0 %v1017_v1  ;;  %v1014_v4 = vld [vmem:[%s1535_s4 + $0x20] sm:$0xff]  ;;  %v1013_v5 = vld [vmem:[%s1535_s4 + $0x18] sm:$0xff]  ;;  %v1012_v6 = vld [vmem:[%s1535_s4 + $0x10] sm:$0xff] }
  0x4a   : > { %v1011_v7 = vld [vmem:[%s1535_s4 + $0x8] sm:$0xff]  ;;  %v1010_v8 = vld [vmem:[%s1535_s4] sm:$0xff]  ;;  %v1009_v9 = vld [vmem:[%s1528_s19] sm:$0xff] }
  0x4d   : > { %429 = vmatpush.bf16.msra.mxu0 %v1016_v2 }
  0x4e   : > { %s870_s11 = sshll.u32 %s351_s7, 4 }
  0x4f   : > { %s353_s22 = scalar_lea.vmem [#allocation2], %s870_s11 }
  0x50   : > { %v354_v10 = vld [vmem:[%s353_s22] sm:$0xff]  ;;  %v355_v13 = vld [vmem:[%s353_s22 + $0x8] sm:$0xff] }
  0x51   : > { %430 = vmatpush.bf16.msra.mxu0 %v1015_v3 }
  0x55   : > { %431 = vmatpush.bf16.msra.mxu0 %v1014_v4 }
  0x59   : > { %432 = vmatpush.bf16.msra.mxu0 %v1013_v5 }
  0x5d   : > { %433 = vmatpush.bf16.msra.mxu0 %v1012_v6 }
  0x61   : > { %434 = vmatpush.bf16.msra.mxu0 %v1011_v7 }
  0x65   : > { %435 = vmatpush.bf16.msra.mxu0 %v1010_v8 }
  0x68   : > { %436 = vmatmul.bf16.vlgmr.msra.gmra.mxu0 %v1009_v9 }
  0xe5   : > { %v437_v11 = vpop.f32.mrf.mxu0 }
  0xe6   : > { %v442_v12 = vadd.f32 %v437_v11, %v354_v10 }
  0xe8   : > { %444 = vst [vmem:[%s353_s22] sm:$0xff] %v442_v12 }
  0xec   : > { %449 = sbr.rel (%p907_p1) target bundleno = 420 (0x1a4), region = 64 }
  0xed   : > { %v439_v14 = vpop.f32.mrf.mxu0 }
  0xee   : > { %v443_v15 = vadd.f32 %v439_v14, %v355_v13 }
  0xf0   : > { %445 = vst [vmem:[%s353_s22 + $0x8] sm:$0xff] %v443_v15 }
  0xf1   : > { %v1033_v16 = vld [vmem:[#allocation11 + $0x78] sm:$0xff]  ;;  %v1032_v19 = vld [vmem:[#allocation11 + $0x70] sm:$0xff]  ;;  %v1031_v22 = vld [vmem:[#allocation11 + $0x68] sm:$0xff] }
  0xf2   : > { %v1025_v17 = vld [vmem:[#allocation11 + $0x38] sm:$0xff]  ;;  %555 = vmatpush.bf16.msra.mxu0 %v1033_v16  ;;  %v1024_v20 = vld [vmem:[#allocation11 + $0x30] sm:$0xff]  ;;  %v1023_v23 = vld [vmem:[#allocation11 + $0x28] sm:$0xff] }
  0xf3   : > { %v1041_v18 = vld [vmem:[#allocation11 + $0xb8] sm:$0xff]  ;;  %617 = vmatpush.bf16.msra.mxu1 %v1025_v17  ;;  %v1040_v21 = vld [vmem:[#allocation11 + $0xb0] sm:$0xff]  ;;  %v1039_v24 = vld [vmem:[#allocation11 + $0xa8] sm:$0xff] }
  0xf4   : > { %709 = vmatpush.bf16.msra.mxu2 %v1041_v18  ;;  %v1030_v25 = vld [vmem:[#allocation11 + $0x60] sm:$0xff]  ;;  %v1029_v28 = vld [vmem:[#allocation11 + $0x58] sm:$0xff]  ;;  %v1028_v31 = vld [vmem:[#allocation11 + $0x50] sm:$0xff] }
  0xf5   : > { %v1022_v26 = vld [vmem:[#allocation11 + $0x20] sm:$0xff]  ;;  %v1021_v29 = vld [vmem:[#allocation11 + $0x18] sm:$0xff]  ;;  %v1020_v32 = vld [vmem:[#allocation11 + $0x10] sm:$0xff] }
  0xf6   : > { %556 = vmatpush.bf16.msra.mxu0 %v1032_v19  ;;  %v1038_v27 = vld [vmem:[#allocation11 + $0xa0] sm:$0xff]  ;;  %v1037_v30 = vld [vmem:[#allocation11 + $0x98] sm:$0xff]  ;;  %v1036_v40 = vld [vmem:[#allocation11 + $0x90] sm:$0xff] }
  0xf7   : > { %618 = vmatpush.bf16.msra.mxu1 %v1024_v20  ;;  %v478_v33 = vld [vmem:[#allocation2 + $0x10] sm:$0xff]  ;;  %v479_v34 = vld [vmem:[#allocation2 + $0x18] sm:$0xff]  ;;  %v1139_v35 = vld [vmem:[#allocation10 + $0x1] ss:$0 sm:$0xff] }
  0xf8   : > { %710 = vmatpush.bf16.msra.mxu2 %v1040_v21  ;;  %v1140_v36 = vld [vmem:[#allocation10] ss:$0 sm:$0xff]  ;;  %v451_v38 = vld [vmem:[#allocation2 + $0x8] sm:$0xff]  ;;  %v1141_v39 = vld [vmem:[#allocation10 + $0x2] ss:$0 sm:$0xff]  ;;  %v485_v43 = vadd.f32 %v1139_v35, %v478_v33  ;;  %v486_v44 = vadd.f32 %v1139_v35, %v479_v34 }
  0xf9   : > { %v450_v37 = vld [vmem:[#allocation2] sm:$0xff]  ;;  %v633_v42 = vld [vmem:[#allocation2 + $0x28] sm:$0xff]  ;;  %v457_v46 = vadd.f32 %v1140_v36, %v451_v38 }
  0xfa   : > { %557 = vmatpush.bf16.msra.mxu0 %v1031_v22  ;;  %v632_v41 = vld [vmem:[#allocation2 + $0x20] sm:$0xff]  ;;  %v456_v45 = vadd.f32 %v1140_v36, %v450_v37  ;;  %v1027_v47 = vld [vmem:[#allocation11 + $0x48] sm:$0xff]  ;;  %v640_v50 = vadd.f32 %v1141_v39, %v633_v42  ;;  %v487_v52 = vmax.f32 %v485_v43, 0.0  ;;  %v488_v53 = vmax.f32 %v486_v44, 0.0 }
  0xfb   : > { %619 = vmatpush.bf16.msra.mxu1 %v1023_v23  ;;  %v1019_v48 = vld [vmem:[#allocation11 + $0x8] sm:$0xff]  ;;  %v639_v49 = vadd.f32 %v1141_v39, %v632_v41  ;;  %v459_v55 = vmax.f32 %v457_v46, 0.0  ;;  %v1026_v56 = vld [vmem:[#allocation11 + $0x40] sm:$0xff]  ;;  %v1142_v3 = vld [vmem:[%s1591_s5] ss:$0 sm:$0xff] }
  0xfc   : > { %711 = vmatpush.bf16.msra.mxu2 %v1039_v24  ;;  %v1035_v51 = vld [vmem:[#allocation11 + $0x88] sm:$0xff]  ;;  %v458_v54 = vmax.f32 %v456_v45, 0.0  ;;  %v1018_v57 = vld [vmem:[#allocation11] sm:$0xff]  ;;  %v642_v59 = vmax.f32 %v640_v50, 0.0  ;;  %v489_v61 = vpack.c.bf16 %v488_v53, %v487_v52 }
  0xfd   : > { %v641_v58 = vmax.f32 %v639_v49, 0.0  ;;  %v1034_v60 = vld [vmem:[#allocation11 + $0x80] sm:$0xff] }
  0xfe   : > { %558 = vmatpush.bf16.msra.mxu0 %v1030_v25  ;;  %v460_v62 = vpack.c.bf16 %v459_v55, %v458_v54 }
  0xff   : > { %620 = vmatpush.bf16.msra.mxu1 %v1022_v26  ;;  %v643_v63 = vpack.c.bf16 %v642_v59, %v641_v58 }
 0x100   : > { %712 = vmatpush.bf16.msra.mxu2 %v1038_v27 }
 0x102   : > { %559 = vmatpush.bf16.msra.mxu0 %v1029_v28 }
 0x103   : > { %621 = vmatpush.bf16.msra.mxu1 %v1021_v29 }
 0x104   : > { %713 = vmatpush.bf16.msra.mxu2 %v1037_v30 }
 0x106   : > { %560 = vmatpush.bf16.msra.mxu0 %v1028_v31 }
 0x107   : > { %622 = vmatpush.bf16.msra.mxu1 %v1020_v32 }
 0x108   : > { %714 = vmatpush.bf16.msra.mxu2 %v1036_v40 }
 0x10a   : > { %561 = vmatpush.bf16.msra.mxu0 %v1027_v47 }
 0x10b   : > { %623 = vmatpush.bf16.msra.mxu1 %v1019_v48 }
 0x10c   : > { %715 = vmatpush.bf16.msra.mxu2 %v1035_v51 }
 0x10e   : > { %562 = vmatpush.bf16.msra.mxu0 %v1026_v56 }
 0x10f   : > { %624 = vmatpush.bf16.msra.mxu1 %v1018_v57 }
 0x110   : > { %716 = vmatpush.bf16.msra.mxu2 %v1034_v60 }
 0x111   : > { %563 = vmatmul.bf16.vlgmr.msra.gmra.mxu0 %v489_v61 }
 0x112   : > { %625 = vmatmul.bf16.vlgmr.msra.gmra.mxu1 %v460_v62 }
 0x113   : > { %717 = vmatmul.bf16.vlgmr.msra.gmra.mxu2 %v643_v63 }
 0x18e   : > { %v564_v0 = vpop.f32.mrf.mxu0 }
 0x18f   : > { %v626_v1 = vpop.f32.mrf.mxu1 }
 0x190   : > { %v627_v2 = vadd.f32 %v626_v1, %v564_v0 }
 0x196   : > { %v718_v4 = vpop.f32.mrf.mxu2  ;;  %v566_v7 = vpop.f32.mrf.mxu0 }
 0x197   : > { %v723_v5 = vadd.f32 %v718_v4, %v627_v2  ;;  %v628_v8 = vpop.f32.mrf.mxu1 }
 0x198   : > { %v629_v9 = vadd.f32 %v628_v8, %v566_v7 }
 0x199   : > { %v729_v6 = vadd.f32 %v1142_v3, %v723_v5 }
 0x19b   : > { %731 = vst [vmem:[#allocation13] sm:$0xff] %v729_v6 }
 0x19e   : > { %v720_v10 = vpop.f32.mrf.mxu2 }
 0x19f   : > { %v724_v11 = vadd.f32 %v720_v10, %v629_v9 }
 0x1a1   : > { %v730_v12 = vadd.f32 %v1142_v3, %v724_v11 }
 0x1a3   : > { %732 = vst [vmem:[#allocation13 + $0x8] sm:$0xff] %v730_v12 }
 0x1a4 PF: > { %p1077_p3 = scmp.eq.s32.totalorder %s1452_s30, 2  ;;  %s743_s10 = sshll.u32 %s1592_s6, 4  ;;  %s744_s10 = int_to_ptr.hbm [resolvable:$true] %s743_s10 }
 0x1a5   : > { %s1382_s12 = smov [#allocation13]   ;;  %s1383_s16 = smov 128  }
 0x1a6   : > { %s741_s15 = sshll.u32 %s1382_s12, 4  ;;  %s1384_s25 = smov 8   ;;  %s742_s15 = int_to_ptr.vmem [resolvable:$true] %s741_s15 }
 0x1a7   : > { %1055 = dma.vmem_to_hbm [thread:$0]  (%p1077_p3), %s742_s15, 256, %s744_s10, [#allocation7], %s1383_s16, %s1383_s16, %s1384_s25  }
 0x1a8   : > { %1346 = dma.done.wait (%p1077_p3), [#allocation7], 256  }
 0x1a9   : > { %1348 = vsyncadd (%p1077_p3), [#allocation7], 4294967040 }
 0x1aa PF: > { %s32_s29 = sadd.s32 1, %s1371_s29   ;;  %s1606_s25 = smov %s1355_s26 }
 0x1ab   : > { %p29_p4 = scmp.ge.s32.totalorder %s32_s29, 5   ;;  %s1607_s26 = smov %s1359_s27 }
 0x1ac   : > { %s1608_s27 = smov %s1498_s13  ;;  %s1609_s28 = smov %s1367_s0 }
 0x1ad   : > { %s1610_s0 = smov %s1612_s23  ;;  %31 = sbr.rel (!%p29_p4) target bundleno = 16 (0x10), region = 114 }
 0x1b2   :  { %760 = vsyncpa [#allocation6], 1 }
 0x1b3   :  { %762 = vsyncpa [#allocation6 + $0x1], 1 }
 0x1b4   :  { %763 = vsyncpa [#allocation9], 1 }
 0x1b5   :  { %765 = vsyncpa [#allocation9 + $0x1], 1 }
 0x1b6   :  { %766 = vsyncpa [#allocation12], 1 }
 0x1b7   :  { %767 = vsyncpa [#allocation7], 1 }
 0x1b8   :  { %769 = vsyncpa [#allocation7 + $0x1], 1 }

</bundles_post_ra>
